<compile_context>
chip_gen: v7x
topology: tpu7x:2x2x1
jax: 0.10.0
libtpu: 0.0.40
codegen_flags: <defaults>
</compile_context>

<pallas_src>
import math
from functools import partial

import jax
import jax.numpy as jnp
from jax import lax
from jax.experimental import pallas as pl
from jax.experimental.pallas import tpu as pltpu


def _attn_kernel(*refs, nh, d, scale, has_mask, compute_dtype):
    # refs (per batch element):
    #   x_ref:    (S, H)      hidden states
    #   w_ref:    (H, 3H)     fused [Wq.T | Wk.T | Wv.T]
    #   b_ref:    (1, 3H)     fused [bq | bk | bv]
    #   mask_ref: (1, S)      additive key mask (only if has_mask)
    #   o_ref:    (S, H)      context output (heads concatenated on last axis)
    if has_mask:
        x_ref, w_ref, b_ref, mask_ref, o_ref = refs
    else:
        x_ref, w_ref, b_ref, o_ref = refs
        mask_ref = None

    H = nh * d

    x = x_ref[...].astype(compute_dtype)
    w = w_ref[...]                       # already in compute_dtype (cast in wrapper)

    # Fused QKV projection: one lane-dense MXU matmul, f32 accumulation.
    qkv = jnp.dot(x, w, preferred_element_type=jnp.float32) + b_ref[...]

    q = qkv[:, 0:H] * scale              # fold 1/sqrt(d) into q (S*d muls, not S*S)
    k = qkv[:, H:2 * H]
    v = qkv[:, 2 * H:3 * H]

    ctx_heads = []
    for h in range(nh):                  # static unroll over heads, all in-register
        qh = q[:, h * d:(h + 1) * d]
        kh = k[:, h * d:(h + 1) * d]
        vh = v[:, h * d:(h + 1) * d]

        # NT matmul: contract last dims of q and k, no explicit k transpose.
        scores = lax.dot_general(
            qh.astype(compute_dtype), kh.astype(compute_dtype),
            dimension_numbers=(((1,), (1,)), ((), ())),
            preferred_element_type=jnp.float32)
        if mask_ref is not None:
            scores = scores + mask_ref[...]          # (1, S) broadcast over queries

        # Numerically-stable softmax; normalization deferred to the context.
        m = jnp.max(scores, axis=-1, keepdims=True)
        e = jnp.exp(scores - m)
        denom = jnp.sum(e, axis=-1, keepdims=True)
        # TODO(synk): attention_probs dropout omitted (eval mode => identity)

        ctx = jnp.dot(e.astype(compute_dtype), vh.astype(compute_dtype),
                      preferred_element_type=jnp.float32)
        ctx = ctx * pl.reciprocal(denom, approx=False)   # S*d divides, not S*S
        ctx_heads.append(ctx)

    # Single lane-dense (S, H) store; concat along last axis reproduces the
    # module's permute(0,2,1,3).view(B, S, all_head_size).
    o_ref[...] = jnp.concatenate(ctx_heads, axis=-1).astype(o_ref.dtype)


def roberta_self_attention(hidden_states, params, attention_mask=None,
                           num_attention_heads=4,
                           compute_dtype=jnp.float32):
    """Pallas implementation of RobertaSelfAttention.forward (absolute pos-emb).

    hidden_states: [B, S, H] float32
    params: dict with PyTorch-layout Linear params:
        q_w/k_w/v_w : [H, H]  (out_features, in_features)
        q_b/k_b/v_b : [H]
    attention_mask: optional additive mask of shape [B, 1, 1, S] (float).
    compute_dtype: dtype fed to the MXU (use jnp.bfloat16 on v6e/v7x for
                   ~2x matmul throughput; accumulation stays f32).
    Returns context_layer: [B, S, H].
    """
    B, S, H = hidden_states.shape
    nh = num_attention_heads
    d = H // nh
    assert nh * d == H

    # PyTorch nn.Linear computes y = x @ W.T + b with W of shape [out, in].
    # Fuse the three projections into one (H, 3H) weight / (1, 3H) bias.
    w_qkv = jnp.concatenate(
        [params["q_w"].T, params["k_w"].T, params["v_w"].T], axis=1
    ).astype(compute_dtype)
    b_qkv = jnp.concatenate(
        [params["q_b"], params["k_b"], params["v_b"]]
    ).reshape(1, 3 * H).astype(jnp.float32)

    has_mask = attention_mask is not None

    in_specs = [
        pl.BlockSpec((None, S, H), lambda b: (b, 0, 0)),       # hidden states
        pl.BlockSpec((H, 3 * H), lambda b: (0, 0)),            # fused W (grid-invariant)
        pl.BlockSpec((1, 3 * H), lambda b: (0, 0)),            # fused bias
    ]
    args = [hidden_states, w_qkv, b_qkv]
    if has_mask:
        mask_b1s = attention_mask.astype(jnp.float32).reshape(B, 1, S)
        in_specs.append(pl.BlockSpec((None, 1, S), lambda b: (b, 0, 0)))
        args.append(mask_b1s)

    kernel = partial(_attn_kernel, nh=nh, d=d, scale=1.0 / math.sqrt(d),
                     has_mask=has_mask, compute_dtype=compute_dtype)

    out = pl.pallas_call(
        kernel,
        out_shape=jax.ShapeDtypeStruct((B, S, H), hidden_states.dtype),
        grid=(B,),
        in_specs=in_specs,
        out_specs=pl.BlockSpec((None, S, H), lambda b: (b, 0, 0)),
        compiler_params=pltpu.CompilerParams(
            dimension_semantics=("parallel",)),
    )(*args)
    return out


def _reference_attention(hidden_states, params, attention_mask, nh):
    """Pure-JAX reference mirroring the PyTorch forward, for verification."""
    B, S, H = hidden_states.shape
    d = H // nh

    def lin(x, w, b):
        return x @ w.T + b

    def split(x):  # transpose_for_scores
        return jnp.transpose(x.reshape(B, S, nh, d), (0, 2, 1, 3))

    q = split(lin(hidden_states, params["q_w"], params["q_b"]))
    k = split(lin(hidden_states, params["k_w"], params["k_b"]))
    v = split(lin(hidden_states, params["v_w"], params["v_b"]))

    scores = jnp.einsum("bhqd,bhkd->bhqk", q, k) / math.sqrt(d)
    if attention_mask is not None:
        scores = scores + attention_mask
    probs = jax.nn.softmax(scores, axis=-1)
    ctx = jnp.einsum("bhqk,bhkd->bhqd", probs, v)
    return jnp.transpose(ctx, (0, 2, 1, 3)).reshape(B, S, H)


if __name__ == "__main__":
    # Small config: batch=2, seq=8, hidden=32, heads=4 (head_dim=8)
    B, S, H, NH = 2, 8, 32, 4

    key = jax.random.PRNGKey(0)
    ks = jax.random.split(key, 8)
    params = {
        "q_w": jax.random.normal(ks[0], (H, H), jnp.float32) * 0.05,
        "k_w": jax.random.normal(ks[1], (H, H), jnp.float32) * 0.05,
        "v_w": jax.random.normal(ks[2], (H, H), jnp.float32) * 0.05,
        "q_b": jax.random.normal(ks[3], (H,), jnp.float32) * 0.05,
        "k_b": jax.random.normal(ks[4], (H,), jnp.float32) * 0.05,
        "v_b": jax.random.normal(ks[5], (H,), jnp.float32) * 0.05,
    }
    hidden = jax.random.normal(ks[6], (B, S, H), jnp.float32)

    # Additive attention mask [B, 1, 1, S]: mask out the last 2 keys of batch 1.
    pad = jnp.zeros((B, S), jnp.float32).at[1, -2:].set(-1e9)
    attention_mask = pad.reshape(B, 1, 1, S)

    out = roberta_self_attention(hidden, params, attention_mask,
                                 num_attention_heads=NH)
    out = jax.block_until_ready(out)

    ref = _reference_attention(hidden, params, attention_mask, NH)
    assert out.shape == (B, S, H)
    assert jnp.allclose(out, ref, atol=2e-5, rtol=2e-5), "mismatch vs reference"

    # Also exercise the no-mask path (mask input is dropped entirely).
    out_nm = jax.block_until_ready(
        roberta_self_attention(hidden, params, None, num_attention_heads=NH))
    ref_nm = _reference_attention(hidden, params, None, NH)
    assert jnp.allclose(out_nm, ref_nm, atol=2e-5, rtol=2e-5), "mismatch (no mask)"

    print("KERNEL_OK")
</pallas_src>

<mosaic_0001>
module attributes {stable_mosaic.version = 11 : i64} {
  func.func @_attn_kernel(%arg0: i32, %arg1: memref<1x8x32xf32, #tpu.memory_space<vmem>>, %arg2: memref<32x96xf32, #tpu.memory_space<vmem>>, %arg3: memref<1x96xf32, #tpu.memory_space<vmem>>, %arg4: memref<1x1x8xf32, #tpu.memory_space<vmem>>, %arg5: memref<1x8x32xf32, #tpu.memory_space<vmem>>) attributes {dimension_semantics = [#tpu.dimension_semantics<parallel>], iteration_bounds = array<i64: 2>, scalar_prefetch = 0 : i64, scratch_operands = 0 : i64, tpu.core_type = #tpu.core_type<tc>, window_params = [{transform_indices = @transform_0, window_bounds = array<i64: 1, 8, 32>}, {pipeline_mode = #tpu.pipeline_mode<synchronous>, transform_indices = @transform_1, window_bounds = array<i64: 32, 96>}, {pipeline_mode = #tpu.pipeline_mode<synchronous>, transform_indices = @transform_2, window_bounds = array<i64: 1, 96>}, {transform_indices = @transform_3, window_bounds = array<i64: 1, 1, 8>}, {transform_indices = @transform_4, window_bounds = array<i64: 1, 8, 32>}]} {
    %c0 = arith.constant 0 : index
    %c0_0 = arith.constant 0 : index
    %c0_1 = arith.constant 0 : index
    %0 = vector.load %arg1[%c0, %c0_0, %c0_1] : memref<1x8x32xf32, #tpu.memory_space<vmem>>, vector<1x8x32xf32>
    %1 = vector.shape_cast %0 : vector<1x8x32xf32> to vector<8x32xf32>
    %c0_2 = arith.constant 0 : index
    %c0_3 = arith.constant 0 : index
    %2 = vector.load %arg2[%c0_2, %c0_3] : memref<32x96xf32, #tpu.memory_space<vmem>>, vector<32x96xf32>
    %cst = arith.constant dense<0.000000e+00> : vector<8x96xf32>
    %3 = tpu.matmul %1, %2, %cst {dimension_numbers = #tpu.dot_dimension_numbers<[1], [0], [0], [1], [0, 0, 1, 1], [], []>} : vector<8x32xf32>, vector<32x96xf32>, vector<8x96xf32> -> vector<8x96xf32>
    %c0_4 = arith.constant 0 : index
    %c0_5 = arith.constant 0 : index
    %4 = vector.load %arg3[%c0_4, %c0_5] : memref<1x96xf32, #tpu.memory_space<vmem>>, vector<1x96xf32>
    %5 = vector.broadcast %4 : vector<1x96xf32> to vector<8x96xf32>
    %6 = arith.addf %3, %5 : vector<8x96xf32>
    %7 = vector.extract_strided_slice %6 {offsets = [0, 0], sizes = [8, 32], strides = [1, 1]} : vector<8x96xf32> to vector<8x32xf32>
    %cst_6 = arith.constant 0.353553385 : f32
    %8 = vector.broadcast %cst_6 : f32 to vector<8x32xf32>
    %9 = arith.mulf %7, %8 : vector<8x32xf32>
    %10 = vector.extract_strided_slice %6 {offsets = [0, 32], sizes = [8, 32], strides = [1, 1]} : vector<8x96xf32> to vector<8x32xf32>
    %11 = vector.extract_strided_slice %6 {offsets = [0, 64], sizes = [8, 32], strides = [1, 1]} : vector<8x96xf32> to vector<8x32xf32>
    %12 = vector.extract_strided_slice %9 {offsets = [0, 0], sizes = [8, 8], strides = [1, 1]} : vector<8x32xf32> to vector<8x8xf32>
    %13 = vector.extract_strided_slice %10 {offsets = [0, 0], sizes = [8, 8], strides = [1, 1]} : vector<8x32xf32> to vector<8x8xf32>
    %14 = vector.extract_strided_slice %11 {offsets = [0, 0], sizes = [8, 8], strides = [1, 1]} : vector<8x32xf32> to vector<8x8xf32>
    %cst_7 = arith.constant dense<0.000000e+00> : vector<8x8xf32>
    %15 = tpu.matmul %12, %13, %cst_7 {dimension_numbers = #tpu.dot_dimension_numbers<[1], [1], [0], [0], [0, 0, 1, 0], [], []>} : vector<8x8xf32>, vector<8x8xf32>, vector<8x8xf32> -> vector<8x8xf32>
    %c0_8 = arith.constant 0 : index
    %c0_9 = arith.constant 0 : index
    %c0_10 = arith.constant 0 : index
    %16 = vector.load %arg4[%c0_8, %c0_9, %c0_10] : memref<1x1x8xf32, #tpu.memory_space<vmem>>, vector<1x1x8xf32>
    %17 = vector.shape_cast %16 : vector<1x1x8xf32> to vector<1x8xf32>
    %18 = vector.broadcast %17 : vector<1x8xf32> to vector<8x8xf32>
    %19 = arith.addf %15, %18 : vector<8x8xf32>
    %cst_11 = arith.constant dense<0xFF800000> : vector<8xf32>
    %20 = vector.multi_reduction <maximumf>, %19, %cst_11 [1] : vector<8x8xf32> to vector<8xf32>
    %21 = vector.shape_cast %20 : vector<8xf32> to vector<8x1xf32>
    %22 = vector.broadcast %21 : vector<8x1xf32> to vector<8x8xf32>
    %23 = arith.subf %19, %22 : vector<8x8xf32>
    %24 = math.exp %23 : vector<8x8xf32>
    %cst_12 = arith.constant dense<0.000000e+00> : vector<8xf32>
    %25 = vector.multi_reduction <add>, %24, %cst_12 [1] : vector<8x8xf32> to vector<8xf32>
    %26 = vector.shape_cast %25 : vector<8xf32> to vector<8x1xf32>
    %cst_13 = arith.constant dense<0.000000e+00> : vector<8x8xf32>
    %27 = tpu.matmul %24, %14, %cst_13 {dimension_numbers = #tpu.dot_dimension_numbers<[1], [0], [0], [1], [0, 0, 1, 1], [], []>} : vector<8x8xf32>, vector<8x8xf32>, vector<8x8xf32> -> vector<8x8xf32>
    %28 = tpu.reciprocal %26 : vector<8x1xf32> -> vector<8x1xf32>
    %29 = vector.broadcast %28 : vector<8x1xf32> to vector<8x8xf32>
    %30 = arith.mulf %27, %29 : vector<8x8xf32>
    %31 = vector.extract_strided_slice %9 {offsets = [0, 8], sizes = [8, 8], strides = [1, 1]} : vector<8x32xf32> to vector<8x8xf32>
    %32 = vector.extract_strided_slice %10 {offsets = [0, 8], sizes = [8, 8], strides = [1, 1]} : vector<8x32xf32> to vector<8x8xf32>
    %33 = vector.extract_strided_slice %11 {offsets = [0, 8], sizes = [8, 8], strides = [1, 1]} : vector<8x32xf32> to vector<8x8xf32>
    %cst_14 = arith.constant dense<0.000000e+00> : vector<8x8xf32>
    %34 = tpu.matmul %31, %32, %cst_14 {dimension_numbers = #tpu.dot_dimension_numbers<[1], [1], [0], [0], [0, 0, 1, 0], [], []>} : vector<8x8xf32>, vector<8x8xf32>, vector<8x8xf32> -> vector<8x8xf32>
    %c0_15 = arith.constant 0 : index
    %c0_16 = arith.constant 0 : index
    %c0_17 = arith.constant 0 : index
    %35 = vector.load %arg4[%c0_15, %c0_16, %c0_17] : memref<1x1x8xf32, #tpu.memory_space<vmem>>, vector<1x1x8xf32>
    %36 = vector.shape_cast %35 : vector<1x1x8xf32> to vector<1x8xf32>
    %37 = vector.broadcast %36 : vector<1x8xf32> to vector<8x8xf32>
    %38 = arith.addf %34, %37 : vector<8x8xf32>
    %cst_18 = arith.constant dense<0xFF800000> : vector<8xf32>
    %39 = vector.multi_reduction <maximumf>, %38, %cst_18 [1] : vector<8x8xf32> to vector<8xf32>
    %40 = vector.shape_cast %39 : vector<8xf32> to vector<8x1xf32>
    %41 = vector.broadcast %40 : vector<8x1xf32> to vector<8x8xf32>
    %42 = arith.subf %38, %41 : vector<8x8xf32>
    %43 = math.exp %42 : vector<8x8xf32>
    %cst_19 = arith.constant dense<0.000000e+00> : vector<8xf32>
    %44 = vector.multi_reduction <add>, %43, %cst_19 [1] : vector<8x8xf32> to vector<8xf32>
    %45 = vector.shape_cast %44 : vector<8xf32> to vector<8x1xf32>
    %cst_20 = arith.constant dense<0.000000e+00> : vector<8x8xf32>
    %46 = tpu.matmul %43, %33, %cst_20 {dimension_numbers = #tpu.dot_dimension_numbers<[1], [0], [0], [1], [0, 0, 1, 1], [], []>} : vector<8x8xf32>, vector<8x8xf32>, vector<8x8xf32> -> vector<8x8xf32>
    %47 = tpu.reciprocal %45 : vector<8x1xf32> -> vector<8x1xf32>
    %48 = vector.broadcast %47 : vector<8x1xf32> to vector<8x8xf32>
    %49 = arith.mulf %46, %48 : vector<8x8xf32>
    %50 = vector.extract_strided_slice %9 {offsets = [0, 16], sizes = [8, 8], strides = [1, 1]} : vector<8x32xf32> to vector<8x8xf32>
    %51 = vector.extract_strided_slice %10 {offsets = [0, 16], sizes = [8, 8], strides = [1, 1]} : vector<8x32xf32> to vector<8x8xf32>
    %52 = vector.extract_strided_slice %11 {offsets = [0, 16], sizes = [8, 8], strides = [1, 1]} : vector<8x32xf32> to vector<8x8xf32>
    %cst_21 = arith.constant dense<0.000000e+00> : vector<8x8xf32>
    %53 = tpu.matmul %50, %51, %cst_21 {dimension_numbers = #tpu.dot_dimension_numbers<[1], [1], [0], [0], [0, 0, 1, 0], [], []>} : vector<8x8xf32>, vector<8x8xf32>, vector<8x8xf32> -> vector<8x8xf32>
    %c0_22 = arith.constant 0 : index
    %c0_23 = arith.constant 0 : index
    %c0_24 = arith.constant 0 : index
    %54 = vector.load %arg4[%c0_22, %c0_23, %c0_24] : memref<1x1x8xf32, #tpu.memory_space<vmem>>, vector<1x1x8xf32>
    %55 = vector.shape_cast %54 : vector<1x1x8xf32> to vector<1x8xf32>
    %56 = vector.broadcast %55 : vector<1x8xf32> to vector<8x8xf32>
    %57 = arith.addf %53, %56 : vector<8x8xf32>
    %cst_25 = arith.constant dense<0xFF800000> : vector<8xf32>
    %58 = vector.multi_reduction <maximumf>, %57, %cst_25 [1] : vector<8x8xf32> to vector<8xf32>
    %59 = vector.shape_cast %58 : vector<8xf32> to vector<8x1xf32>
    %60 = vector.broadcast %59 : vector<8x1xf32> to vector<8x8xf32>
    %61 = arith.subf %57, %60 : vector<8x8xf32>
    %62 = math.exp %61 : vector<8x8xf32>
    %cst_26 = arith.constant dense<0.000000e+00> : vector<8xf32>
    %63 = vector.multi_reduction <add>, %62, %cst_26 [1] : vector<8x8xf32> to vector<8xf32>
    %64 = vector.shape_cast %63 : vector<8xf32> to vector<8x1xf32>
    %cst_27 = arith.constant dense<0.000000e+00> : vector<8x8xf32>
    %65 = tpu.matmul %62, %52, %cst_27 {dimension_numbers = #tpu.dot_dimension_numbers<[1], [0], [0], [1], [0, 0, 1, 1], [], []>} : vector<8x8xf32>, vector<8x8xf32>, vector<8x8xf32> -> vector<8x8xf32>
    %66 = tpu.reciprocal %64 : vector<8x1xf32> -> vector<8x1xf32>
    %67 = vector.broadcast %66 : vector<8x1xf32> to vector<8x8xf32>
    %68 = arith.mulf %65, %67 : vector<8x8xf32>
    %69 = vector.extract_strided_slice %9 {offsets = [0, 24], sizes = [8, 8], strides = [1, 1]} : vector<8x32xf32> to vector<8x8xf32>
    %70 = vector.extract_strided_slice %10 {offsets = [0, 24], sizes = [8, 8], strides = [1, 1]} : vector<8x32xf32> to vector<8x8xf32>
    %71 = vector.extract_strided_slice %11 {offsets = [0, 24], sizes = [8, 8], strides = [1, 1]} : vector<8x32xf32> to vector<8x8xf32>
    %cst_28 = arith.constant dense<0.000000e+00> : vector<8x8xf32>
    %72 = tpu.matmul %69, %70, %cst_28 {dimension_numbers = #tpu.dot_dimension_numbers<[1], [1], [0], [0], [0, 0, 1, 0], [], []>} : vector<8x8xf32>, vector<8x8xf32>, vector<8x8xf32> -> vector<8x8xf32>
    %c0_29 = arith.constant 0 : index
    %c0_30 = arith.constant 0 : index
    %c0_31 = arith.constant 0 : index
    %73 = vector.load %arg4[%c0_29, %c0_30, %c0_31] : memref<1x1x8xf32, #tpu.memory_space<vmem>>, vector<1x1x8xf32>
    %74 = vector.shape_cast %73 : vector<1x1x8xf32> to vector<1x8xf32>
    %75 = vector.broadcast %74 : vector<1x8xf32> to vector<8x8xf32>
    %76 = arith.addf %72, %75 : vector<8x8xf32>
    %cst_32 = arith.constant dense<0xFF800000> : vector<8xf32>
    %77 = vector.multi_reduction <maximumf>, %76, %cst_32 [1] : vector<8x8xf32> to vector<8xf32>
    %78 = vector.shape_cast %77 : vector<8xf32> to vector<8x1xf32>
    %79 = vector.broadcast %78 : vector<8x1xf32> to vector<8x8xf32>
    %80 = arith.subf %76, %79 : vector<8x8xf32>
    %81 = math.exp %80 : vector<8x8xf32>
    %cst_33 = arith.constant dense<0.000000e+00> : vector<8xf32>
    %82 = vector.multi_reduction <add>, %81, %cst_33 [1] : vector<8x8xf32> to vector<8xf32>
    %83 = vector.shape_cast %82 : vector<8xf32> to vector<8x1xf32>
    %cst_34 = arith.constant dense<0.000000e+00> : vector<8x8xf32>
    %84 = tpu.matmul %81, %71, %cst_34 {dimension_numbers = #tpu.dot_dimension_numbers<[1], [0], [0], [1], [0, 0, 1, 1], [], []>} : vector<8x8xf32>, vector<8x8xf32>, vector<8x8xf32> -> vector<8x8xf32>
    %85 = tpu.reciprocal %83 : vector<8x1xf32> -> vector<8x1xf32>
    %86 = vector.broadcast %85 : vector<8x1xf32> to vector<8x8xf32>
    %87 = arith.mulf %84, %86 : vector<8x8xf32>
    %88 = tpu.concatenate %30, %49, %68, %87 in 1 : vector<8x8xf32>, vector<8x8xf32>, vector<8x8xf32>, vector<8x8xf32> -> vector<8x32xf32>
    %c0_35 = arith.constant 0 : index
    %c0_36 = arith.constant 0 : index
    %c0_37 = arith.constant 0 : index
    %89 = vector.load %arg5[%c0_35, %c0_36, %c0_37] : memref<1x8x32xf32, #tpu.memory_space<vmem>>, vector<1x8x32xf32>
    %90 = vector.shape_cast %89 : vector<1x8x32xf32> to vector<8x32xf32>
    %91 = vector.shape_cast %88 : vector<8x32xf32> to vector<1x8x32xf32>
    tpu.vector_store %arg5[%c0_35, %c0_36, %c0_37], %91 {strides = array<i32>} : memref<1x8x32xf32, #tpu.memory_space<vmem>>, vector<1x8x32xf32>,
    return
  }
  func.func @transform_0(%arg0: i32) -> (i32, i32, i32) {
    %c0_i32 = arith.constant 0 : i32
    %c0_i32_0 = arith.constant 0 : i32
    %c0_i32_1 = arith.constant 0 : i32
    return %arg0, %c0_i32, %c0_i32_0 : i32, i32, i32
  }
  func.func @transform_1(%arg0: i32) -> (i32, i32) {
    %c0_i32 = arith.constant 0 : i32
    %c0_i32_0 = arith.constant 0 : i32
    %c0_i32_1 = arith.constant 0 : i32
    return %c0_i32, %c0_i32_0 : i32, i32
  }
  func.func @transform_2(%arg0: i32) -> (i32, i32) {
    %c0_i32 = arith.constant 0 : i32
    %c0_i32_0 = arith.constant 0 : i32
    %c0_i32_1 = arith.constant 0 : i32
    return %c0_i32, %c0_i32_0 : i32, i32
  }
  func.func @transform_3(%arg0: i32) -> (i32, i32, i32) {
    %c0_i32 = arith.constant 0 : i32
    %c0_i32_0 = arith.constant 0 : i32
    %c0_i32_1 = arith.constant 0 : i32
    return %arg0, %c0_i32, %c0_i32_0 : i32, i32, i32
  }
  func.func @transform_4(%arg0: i32) -> (i32, i32, i32) {
    %c0_i32 = arith.constant 0 : i32
    %c0_i32_0 = arith.constant 0 : i32
    %c0_i32_1 = arith.constant 0 : i32
    return %arg0, %c0_i32, %c0_i32_0 : i32, i32, i32
  }
}

</mosaic_0001>

<bundles_post_ra>
// kernel: tpu_custom_call.1
= control target key start
LH: loop header
LB: loop body
LE: loop exit
PB: predicated region body
PF: predicated region fallthrough
CT: control target
= control target key end

     0   :  { %9 = vsyncpa [#allocation3], 0  ;;  %s1762_s0 = inlined_call_operand.hbm [shape: f32[2,8,32], index: 0, kind: input, shape index: {}]   ;;  %s1763_s1 = inlined_call_operand.hbm [shape: f32[32,96], index: 1, kind: input, shape index: {}]   ;;  %s1764_s2 = inlined_call_operand.vmem [shape: f32[1,96], index: 2, kind: input, shape index: {}]   ;;  %s1765_s3 = inlined_call_operand.vmem [shape: f32[2,1,8], index: 3, kind: input, shape index: {}]   ;;  %s1766_s4 = inlined_call_operand.hbm [shape: f32[2,8,32], index: 4, kind: output, shape index: {}]  }
   0x1   :  { %11 = vsyncpa [#allocation3 + $0x1], 0 }
   0x2   :  { %12 = vsyncpa [#allocation6], 0 }
   0x3   :  { %13 = vsyncpa [#allocation4], 0 }
   0x4   :  { %15 = vsyncpa [#allocation4 + $0x1], 0  ;;  %s1494_s15 = smov 0   ;;  %s1496_s16 = smov 0  }
   0x5   :  { %s1498_s17 = smov 0   ;;  %s1500_s18 = smov 0  }
   0x6 LB: > { %s1515_s19 = sadd.s32 4294967295, %s1445_s18   ;;  %s1118_s20 = sadd.s32 4294967294, %s1445_s18   ;;  %s1445_s18 = sphi %s1500_s18, %s1786_s18   ;;  %s1441_s17 = sphi %s1498_s17, %s1785_s17   ;;  %s1437_s16 = sphi %s1496_s16, %s1784_s16   ;;  %s1433_s15 = sphi %s1494_s15, %s1783_s15  }
   0x7   : > { %p41_p0 = scmp.ne.s32.totalorder %s1437_s16, %s1433_s15  ;;  %p1767_p1 = scmp.eq.s32.totalorder %s1515_s19, 0 }
   0x8   : > { %p139_p3 = scmp.eq.s32.totalorder %s1118_s20, 1  ;;  %p1119_p5 = scmp.ge.s32.totalorder %s1445_s18, 1 }
   0x9   : > { %p1524_p4 = por %p1767_p1, %p41_p0  ;;  %p146_p7 = scmp.lt.s32.totalorder %s1445_s18, 3 }
   0xa   : > { %p1529_p6 = por %p139_p3, %p41_p0  ;;  %s1447_s24 = smov [#allocation5]  }
   0xb   : > { %s1770_s21 = scalar_select %p1524_p4, 1, 0 }
   0xc   : > { %s1771_s22 = scalar_select %p1529_p6, 1, 0 }
   0xd   : > { %p1534_p8 = pnand %p1119_p5, %p146_p7  ;;  %s158_s25 = sshll.u32 %s1447_s24, 4  ;;  %s1538_s25 = int_to_ptr.vmem [resolvable:$true] %s158_s25 }
   0xe   : > { %s1550_s27 = sadd.s32 1, %s1445_s18   ;;  %s28_s28 = sadd.s32 1, %s1441_s17 }
   0xf   : > { %s1772_s23 = scalar_select %p1534_p8, 1, 0 }
  0x10   : > { %p1233_p9 = pneg %p1534_p8  ;;  %s25_s29 = ssub.s32 %s1445_s18, %s1550_s27 }
  0x11   : > { %s1317_s6 = scalar_lea.hbm %s1763_s1, 512 }
  0x12   : > { %p1545_p11 = pnand %p1233_p9, %p1767_p1  ;;  %p1318_p12 = scmp.ne.s32.totalorder %s1763_s1, %s1317_s6 }
  0x13   : > { %p1324_p5 = scmp.lt.u32.totalorder %s1317_s6, %s1763_s1 }
  0x14   : > { %p1319_p13 = pneg %p1545_p11 }
  0x16   : > { %p1320_p0 = pnand %p1319_p13, %p1318_p12 }
  0x18   : > { %p1321_p3 = pneg %p1320_p0 }
  0x1a   : > { %p1326_p7 = pnand %p1324_p5, %p1321_p3 }
  0x1c   : > { %1329 = shalt.err (!%p1326_p7)
}
  0x1d   : > { %s1330_s11 = scalar_lea.vmem %s1538_s25, 512  ;;  %p1338_p2 = scmp.lt.s32.totalorder %s1538_s25, %s1538_s25 }
  0x1e   : > { %p1331_p9 = scmp.ne.s32.totalorder %s1538_s25, %s1330_s11  ;;  %p1339_p6 = scmp.lt.s32.totalorder %s1330_s11, %s1330_s11 }
  0x20   : > { %p1333_p10 = pnand %p1331_p9, %p1319_p13  ;;  %p1340_p4 = por %p1339_p6, %p1338_p2 }
  0x22   : > { %p1334_p1 = pneg %p1333_p10 }
  0x24   : > { %p1341_p8 = pnand %p1340_p4, %p1334_p1 }
  0x26   : > { %1344 = shalt.err (!%p1341_p8)
}
  0x27   : > { %s1448_s12 = smov 128   ;;  %s1449_s13 = smov 8  }
  0x28   : > { %1236 = dma.hbm_to_vmem [thread:$0]  (!%p1545_p11), %s1763_s1, 512, %s1538_s25, [#allocation6], %s1448_s12, %s1448_s12, %s1449_s13  }
  0x29   : > { %p26_p2 = scmp.eq.s32.totalorder %s25_s29, 0  ;;  %p35_p1 = scmp.ne.s32.totalorder %s1441_s17, %s1437_s16 }
  0x2a   : > { %p36_p4 = scmp.eq.s32.totalorder %s1445_s18, 0  ;;  %p1246_p6 = scmp.lt.s32.totalorder %s1445_s18, 2 }
  0x2b   : > { %s1581_s24 = scalar_select %p26_p2, %s1441_s17, %s28_s28  }
  0x2c   : > { %p37_p8 = por %p36_p4, %p35_p1  ;;  %p1774_p10 = scmp.eq.s32.totalorder %s1515_s19, 1 }
  0x2d   : > { %s175_s5 = sand.u32 1, %s1441_s17   ;;  %s1123_s6 = sshll.u32 %s1445_s18, 7 }
  0x2e   : > { %p1585_p12 = por %p1774_p10, %p35_p1  ;;  %s1122_s7 = sshll.u32 %s175_s5, 3 }
  0x2f   : > { %s1594_s9 = scalar_lea.hbm %s1762_s0, %s1123_s6  ;;  %s179_s25 = scalar_lea.vmem [#allocation2], %s1122_s7 }
  0x30   : > { %s186_s28 = sshll.u32 %s179_s25, 4  ;;  %p1596_p11 = pnand %p1246_p6, %p37_p8  ;;  %s1600_s28 = int_to_ptr.vmem [resolvable:$true] %s186_s28 }
  0x31   : > { %s176_s10 = scalar_lea.sflag [#allocation3], %s175_s5  ;;  %s1345_s11 = scalar_lea.hbm %s1594_s9, 128 }
  0x32   : > { %p1346_p13 = scmp.ne.s32.totalorder %s1594_s9, %s1345_s11  ;;  %p1347_p0 = pneg %p1596_p11 }
  0x33   : > { %s1350_s14 = scalar_lea.hbm %s1762_s0, 256  ;;  %p1351_p7 = scmp.lt.u32.totalorder %s1594_s9, %s1762_s0 }
  0x34   : > { %p1348_p3 = pnand %p1347_p0, %p1346_p13  ;;  %p1352_p9 = scmp.lt.u32.totalorder %s1350_s14, %s1345_s11 }
  0x35   : > { %p1354_p1 = scmp.lt.u32.totalorder %s1345_s11, %s1594_s9 }
  0x36   : > { %p1349_p5 = pneg %p1348_p3  ;;  %p1353_p2 = por %p1352_p9, %p1351_p7 }
  0x38   : > { %p1355_p4 = por %p1354_p1, %p1353_p2 }
  0x3a   : > { %p1356_p6 = pnand %p1355_p4, %p1349_p5 }
  0x3c   : > { %1359 = shalt.err (!%p1356_p6)
}
  0x3d   : > { %s1360_s5 = scalar_lea.vmem %s1600_s28, 128  ;;  %s1450_s7 = smov [#allocation2]  }
  0x3e   : > { %p1361_p8 = scmp.ne.s32.totalorder %s1600_s28, %s1360_s5  ;;  %s1365_s26 = sshll.u32 %s1450_s7, 4  ;;  %s1366_s26 = int_to_ptr.vmem [resolvable:$false] %s1365_s26 }
  0x3f   : > { %s1367_s8 = scalar_lea.vmem %s1366_s26, 256  ;;  %p1368_p3 = scmp.lt.s32.totalorder %s1600_s28, %s1366_s26 }
  0x40   : > { %p1363_p10 = pnand %p1361_p8, %p1347_p0  ;;  %p1369_p7 = scmp.lt.s32.totalorder %s1367_s8, %s1360_s5 }
  0x42   : > { %p1364_p13 = pneg %p1363_p10  ;;  %p1370_p9 = por %p1369_p7, %p1368_p3 }
  0x44   : > { %p1371_p2 = pnand %p1370_p9, %p1364_p13 }
  0x46   : > { %1374 = shalt.err (!%p1371_p2)
}
  0x47   : > { %1240 = dma.hbm_to_vmem [thread:$0]  (!%p1596_p11), %s1594_s9, 128, %s1600_s28, %s176_s10  }
  0x48   : > { %p1777_p5 = scmp.ne.s32.totalorder %s1772_s23, 0 }
  0x49   : > { %s1630_s25 = sand.u32 (!%p1777_p5), 1, %s1437_s16   ;;  %p1778_p0 = scmp.ne.s32.totalorder (!%p1777_p5), %s1770_s21, 0 }
  0x4a   : > { %201 = sbr.rel (%p1777_p5) target bundleno = 1196 (0x4ac), region = 36  ;;  %s1125_s11 = sshll.u32 (!%p1777_p5), %s1630_s25, 3 }
  0x4b   : > { %s204_s12 = scalar_lea.sflag (!%p1777_p5), [#allocation3], %s1630_s25  ;;  %s207_s13 = scalar_lea.vmem (!%p1777_p5), [#allocation2], %s1125_s11 }
  0x51   : > { %1420 = dma.done.wait (%p1778_p0), %s204_s12, 128  }
  0x52   : > { %1422 = vsyncadd (%p1778_p0), %s204_s12, 4294967168  ;;  %p1779_p11 = scmp.eq.s32.totalorder %s1515_s19, 0 }
  0x54   : > { %1424 = dma.done.wait (%p1779_p11), [#allocation6], 512   ;;  %p1780_p1 = pmov %p1779_p11 }
  0x55   : > { %v1451_v0 = vmov 0.0|0.0   ;;  %vm1452_vm0 = vmmov 0   ;;  %v1453_v1 = vmov 0.0   ;;  %v243_v2 = vld [vmem:[#allocation5] sm:$0xff]  ;;  %v244_v3 = vld [vmem:[#allocation5 + $0x8] sm:$0xff]  ;;  %v245_v4 = vld [vmem:[#allocation5 + $0x10] sm:$0xff] }
  0x56   : > { %1426 = vsyncadd (%p1780_p1), [#allocation6], 4294966784  ;;  %1219 = vmatprep.subr.bf16.mxu0 %v1451_v0  ;;  %1176 = vmatprep.mubr.msk.f32.mxu0 %vm1452_vm0, %v1453_v1  ;;  %v1220_v5 = vpack.c.bf16 %v244_v3, %v243_v2  ;;  %v246_v6 = vld [vmem:[#allocation5 + $0x18] sm:$0xff]  ;;  %vm254_vm1 = vcmask 261120   ;;  %v1128_v9 = vld [vmem:[%s1764_s2] ss:$0 sm:$0xff] }
  0x57   : > { %1179 = vmatprep.subr.mxu1 %v1453_v1  ;;  %1181 = vmatprep.mubr.msk.f32.mxu1 %vm1452_vm0, %v1453_v1  ;;  %v1223_v7 = vpack.c.bf16 %v246_v6, %v245_v4  ;;  %v242_v8 = vld [vmem:[%s207_s13] sm:$0xff]  ;;  %s1454_s9 = smov 96   ;;  %s1455_s28 = smov 120   ;;  %vm339_vm2 = vcmask 64512   ;;  %vm1010_vm3 = vcmask 130048   ;;  %vm1012_vm4 = vcmask 195584  }
  0x58   : > { %1221 = vmatpush3.bf16.msra.mxu0 %v1220_v5  ;;  %s1456_s29 = smov 88   ;;  %s1457_s10 = smov 80  }
  0x59   : > { %1222 = vmatprep.subr.bf16.mxu0 %v1451_v0  ;;  %s1458_s14 = smov 112   ;;  %s1459_s20 = smov 72  }
  0x5a   : > { %s1460_s6 = smov 104   ;;  %p239_p4 = scmp.lt.s32.totalorder %s1515_s19, 1 }
  0x5b   : > { %s1461_s12 = smov 56   ;;  %s1462_s13 = smov 64  }
  0x5c   : > { %1224 = vmatpush3.bf16.msra.mxu0 %v1223_v7  ;;  %s240_s5 = scalar_select %p239_p4, %s1515_s19, 1 }
  0x5d   : > { %1189 = vmatprep.subr.mxu0 %v1453_v1  ;;  %s1463_s21 = smov 40   ;;  %s1464_s23 = smov 48  }
  0x5e   : > { %s241_s8 = scalar_lea.vmem %s1765_s3, %s240_s5  ;;  %s1468_s26 = smov [#allocation7]  }
  0x5f   : > { %1177 = vmatmul.mubr.msk.f32.vlgmr.msra.gmra.mrb[0].mxu0 %vm254_vm1, %v242_v8  ;;  %v1130_v21 = vld [vmem:[%s241_s8] ss:$0 sm:$0xff]  ;;  %s1379_s8 = sshll.u32 %s1468_s26, 4  ;;  %s1380_s8 = int_to_ptr.vmem [resolvable:$false] %s1379_s8 }
  0x60   : > { %1191 = vmatprep.mubr.msk.f32.mxu0 %vm1452_vm0, %v1453_v1 }
 0x132   : > { %v324_v10 = vpop.f32.mrb[0].mxu0 }
 0x133   : > { %v1656_v11 = vadd.f32 %v1128_v9, %v324_v10  ;;  %v1178_v12 = vpop.f32.mrb[1].mxu0 }
 0x135   : > { %337 = vrot.lane.b32.xlu0 %v1656_v11, %s1454_s9  ;;  %v328_v13 = vmul.f32 0.35355338, %v1656_v11  ;;  %s1465_s9 = smov 8  }
 0x137   : > { %502 = vrot.lane.b32.xlu1 %v328_v13, %s1455_s28  ;;  %s1466_s28 = smov 16  }
 0x139   : > { %504 = vrot.lane.b32.xlu0 %v1656_v11, %s1456_s29  ;;  %s1467_s29 = smov 24  }
 0x13b   : > { %669 = vrot.lane.b32.xlu1 %v1656_v11, %s1457_s10  ;;  %s1144_s10 = sshll.u32 %s1515_s19, 7  ;;  %s1016_s19 = scalar_lea.sflag [#allocation4], %s1630_s25 }
 0x13c   : > { %s1717_s7 = scalar_lea.hbm %s1766_s4, %s1144_s10 }
 0x13d   : > { %667 = vrot.lane.b32.xlu0 %v328_v13, %s1458_s14  ;;  %s238_s14 = scalar_lea.vmem [#allocation7], %s1125_s11 }
 0x13f   : > { %834 = vrot.lane.b32.xlu1 %v1656_v11, %s1459_s20  ;;  %s1029_s20 = sshll.u32 %s238_s14, 4  ;;  %s1719_s20 = int_to_ptr.vmem [resolvable:$true] %s1029_s20 }
 0x140   : > { %s1375_s11 = scalar_lea.vmem %s1719_s20, 128  ;;  %p1382_p13 = scmp.lt.s32.totalorder %s1719_s20, %s1380_s8 }
 0x141   : > { %832 = vrot.lane.b32.xlu0 %v328_v13, %s1460_s6  ;;  %p1376_p6 = scmp.ne.s32.totalorder %s1719_s20, %s1375_s11 }
 0x143   : > { %p1377_p8 = pnand %p1376_p6, %p1585_p12 }
 0x145   : > { %p1378_p10 = pneg %p1377_p8 }
 0x1a7   : > { %v338_v14 = vpop.permute.xlu0 %337 }
 0x1a8   : > { %1180 = vmatpush3.xpose.msk.msra.mxu1 %vm339_vm2, %v338_v14 }
 0x1a9   : > { %v503_v15 = vpop.permute.xlu1 %502  ;;  %1184 = vmatprep.subr.mxu1 %v1453_v1 }
 0x1ab   : > { %v505_v16 = vpop.permute.xlu0 %504  ;;  %1182 = vmatmul.mubr.msk.f32.vlgmr.msra.gmra.mrb[0].mxu1 %vm339_vm2, %v328_v13 }
 0x1ac   : > { %1190 = vmatpush3.xpose.msk.msra.mxu0 %vm339_vm2, %v505_v16  ;;  %1186 = vmatprep.mubr.msk.f32.mxu1 %vm1452_vm0, %v1453_v1 }
 0x1ad   : > { %v670_v17 = vpop.permute.xlu1 %669  ;;  %1199 = vmatprep.subr.mxu0 %v1453_v1 }
 0x1af   : > { %1192 = vmatmul.mubr.msk.f32.vlgmr.msra.gmra.mrb[2].mxu0 %vm339_vm2, %v503_v15  ;;  %v668_v18 = vpop.permute.xlu0 %667 }
 0x1b0   : > { %1200 = vmatpush3.xpose.msk.msra.mxu0 %vm339_vm2, %v670_v17  ;;  %1201 = vmatprep.mubr.msk.f32.mxu0 %vm1452_vm0, %v1453_v1 }
 0x1b1   : > { %1209 = vmatprep.subr.mxu0 %v1453_v1  ;;  %v835_v19 = vpop.permute.xlu1 %834 }
 0x1b3   : > { %1202 = vmatmul.mubr.msk.f32.vlgmr.msra.gmra.mrb[4].mxu0 %vm339_vm2, %v668_v18  ;;  %v833_v20 = vpop.permute.xlu0 %832 }
 0x1b4   : > { %1210 = vmatpush3.xpose.msk.msra.mxu0 %vm339_vm2, %v835_v19  ;;  %1211 = vmatprep.mubr.msk.f32.mxu0 %vm1452_vm0, %v1453_v1 }
 0x1b7   : > { %1212 = vmatmul.mubr.msk.f32.vlgmr.msra.gmra.mrb[6].mxu0 %vm339_vm2, %v833_v20 }
 0x27e   : > { %v411_v22 = vpop.f32.mrb[0].mxu1 }
 0x27f   : > { %v412_v23 = vadd.f32 %v1130_v21, %v411_v22  ;;  %v1183_v24 = vpop.f32.mrb[1].mxu1 }
 0x281   : > { %v415_v25 = vsel %vm339_vm2, %v412_v23, -inf }
 0x282   : > { %416 = vmax.xlane.f32.xlu1 %v415_v25  ;;  %v576_v26 = vpop.f32.mrb[2].mxu0 }
 0x283   : > { %v577_v27 = vadd.f32 %v1130_v21, %v576_v26  ;;  %v1193_v28 = vpop.f32.mrb[3].mxu0 }
 0x285   : > { %v580_v29 = vsel %vm339_vm2, %v577_v27, -inf }
 0x286   : > { %581 = vmax.xlane.f32.xlu0 %v580_v29  ;;  %v741_v30 = vpop.f32.mrb[4].mxu0 }
 0x287   : > { %v742_v31 = vadd.f32 %v1130_v21, %v741_v30  ;;  %v1203_v32 = vpop.f32.mrb[5].mxu0 }
 0x289   : > { %v745_v33 = vsel %vm339_vm2, %v742_v31, -inf }
 0x28a   : > { %746 = vmax.xlane.f32.xlu0 %v745_v33  ;;  %v906_v34 = vpop.f32.mrb[6].mxu0 }
 0x28b   : > { %v1213_v35 = vpop.f32.mrb[7].mxu0  ;;  %v907_v36 = vadd.f32 %v1130_v21, %v906_v34 }
 0x28d   : > { %v910_v37 = vsel %vm339_vm2, %v907_v36, -inf }
 0x293   : > { %589 = vrot.lane.b32.xlu1 %v1656_v11, %s1461_s12  ;;  %s1381_s12 = scalar_lea.vmem %s1380_s8, 256 }
 0x294   : > { %p1383_p3 = scmp.lt.s32.totalorder %s1381_s12, %s1375_s11 }
 0x296   : > { %p1384_p7 = por %p1383_p3, %p1382_p13 }
 0x298   : > { %p1385_p9 = pnand %p1384_p7, %p1378_p10 }
 0x2a0   : > { %424 = vrot.lane.b32.xlu0 %v1656_v11, %s1462_s13 }
 0x2a4   : > { %919 = vrot.lane.b32.xlu0 %v1656_v11, %s1463_s21 }
 0x2b7   : > { %911 = vmax.xlane.f32.xlu1 %v910_v37 }
 0x2c8   : > { %754 = vrot.lane.b32.xlu1 %v1656_v11, %s1464_s23 }
 0x30f   : > { %v417_v38 = vpop.xlane.xlu1 %416 }
 0x310   : > { %v418_v39 = vsub.f32 %v412_v23, %v417_v38 }
 0x312   : > { %v419_v40 = vmul.f32 1.442695, %v418_v39 }
 0x313   : > { %v582_v41 = vpop.xlane.xlu0 %581  ;;  %v590_v49 = vpop.permute.xlu1 %589 }
 0x314   : > { %1301 = vpow2.f32 %v419_v40  ;;  %v583_v42 = vsub.f32 %v577_v27, %v582_v41 }
 0x316   : > { %v584_v43 = vmul.f32 1.442695, %v583_v42 }
 0x317   : > { %v747_v44 = vpop.xlane.xlu0 %746 }
 0x318   : > { %1303 = vpow2.f32 %v584_v43  ;;  %v748_v45 = vsub.f32 %v742_v31, %v747_v44 }
 0x31a   : > { %v749_v46 = vmul.f32 1.442695, %v748_v45 }
 0x31b   : > { %v425_v47 = vpop.permute.xlu0 %424 }
 0x31c   : > { %1305 = vpow2.f32 %v749_v46  ;;  %1185 = vmatpush3.msra.mxu1 %v425_v47 }
 0x31d   : > { %1194 = vmatprep.subr.mxu1 %v1453_v1 }
 0x31e   : > { %v1302_v48 = vpop.eup %1301 }
 0x31f   : > { %1187 = vmatmul.mubr.msk.f32.vlgmr.msra.gmra.mrb[2].mxu1 %vm339_vm2, %v1302_v48  ;;  %v421_v54 = vsel %vm339_vm2, %v1302_v48, 0.0  ;;  %v920_v59 = vpop.permute.xlu0 %919 }
 0x320   : > { %1195 = vmatpush3.msra.mxu1 %v590_v49  ;;  %1196 = vmatprep.mubr.msk.f32.mxu1 %vm1452_vm0, %v1453_v1 }
 0x321   : > { %1204 = vmatprep.subr.mxu1 %v1453_v1 }
 0x322   : > { %v1304_v50 = vpop.eup %1303 }
 0x323   : > { %1197 = vmatmul.mubr.msk.f32.vlgmr.msra.gmra.mrb[4].mxu1 %vm339_vm2, %v1304_v50  ;;  %v586_v51 = vsel %vm339_vm2, %v1304_v50, 0.0 }
 0x324   : > { %587 = vadd.xlane.f32.xlu1 %v586_v51  ;;  %1206 = vmatprep.mubr.msk.f32.mxu1 %vm1452_vm0, %v1453_v1 }
 0x326   : > { %v1306_v52 = vpop.eup %1305 }
 0x327   : > { %v751_v53 = vsel %vm339_vm2, %v1306_v52, 0.0 }
 0x328   : > { %752 = vadd.xlane.f32.xlu0 %v751_v53  ;;  %422 = vadd.xlane.f32.xlu1 %v421_v54 }
 0x344   : > { %v912_v55 = vpop.xlane.xlu1 %911 }
 0x345   : > { %v913_v56 = vsub.f32 %v907_v36, %v912_v55 }
 0x347   : > { %v914_v57 = vmul.f32 1.442695, %v913_v56 }
 0x348   : > { %v755_v58 = vpop.permute.xlu1 %754 }
 0x349   : > { %1307 = vpow2.f32 %v914_v57  ;;  %1205 = vmatpush3.msra.mxu1 %v755_v58 }
 0x34a   : > { %1207 = vmatmul.mubr.msk.f32.vlgmr.msra.gmra.mrb[6].mxu1 %vm339_vm2, %v1306_v52  ;;  %1214 = vmatprep.subr.mxu1 %v1453_v1 }
 0x34b   : > { %1215 = vmatpush3.msra.mxu1 %v920_v59  ;;  %1216 = vmatprep.mubr.msk.f32.mxu1 %vm1452_vm0, %v1453_v1 }
 0x353   : > { %v1308_v60 = vpop.eup %1307 }
 0x354   : > { %1217 = vmatmul.mubr.msk.f32.vlgmr.msra.gmra.mrb[8].mxu1 %vm339_vm2, %v1308_v60  ;;  %v916_v61 = vsel %vm339_vm2, %v1308_v60, 0.0 }
 0x355   : > { %917 = vadd.xlane.f32.xlu0 %v916_v61 }
 0x3b1   : > { %v588_v62 = vpop.xlane.xlu1 %587 }
 0x3b2   : > { %1309 = vrcp.f32 %v588_v62 }
 0x3b5   : > { %v753_v6 = vpop.xlane.xlu0 %752  ;;  %v423_v15 = vpop.xlane.xlu1 %422 }
 0x3b6   : > { %1311 = vrcp.f32 %v753_v6 }
 0x3bc   : > { %v1310_v2 = vpop.eup %1309 }
 0x3c0   : > { %v1312_v1 = vpop.eup %1311 }
 0x3e2   : > { %v918_v7 = vpop.xlane.xlu0 %917 }
 0x3e3   : > { %1313 = vrcp.f32 %v918_v7 }
 0x3e4   : > { %1315 = vrcp.f32 %v423_v15 }
 0x3ed   : > { %v1314_v11 = vpop.eup %1313 }
 0x3ee   : > { %v1316_v16 = vpop.eup %1315 }
 0x3f2   : > { %v496_v63 = vpop.f32.mrb[2].mxu1 }
 0x3f3   : > { %v1188_v0 = vpop.f32.mrb[3].mxu1  ;;  %v501_v19 = vmul.f32 %v1316_v16, %v496_v63 }
 0x3f6   : > { %v661_v3 = vpop.f32.mrb[4].mxu1 }
 0x3f7   : > { %v666_v4 = vmul.f32 %v1310_v2, %v661_v3  ;;  %v1198_v5 = vpop.f32.mrb[5].mxu1 }
 0x3f9   : > { %998 = vrot.lane.b32.xlu0 %v666_v4, %s1465_s9 }
 0x41d   : > { %v826_v8 = vpop.f32.mrb[6].mxu1 }
 0x41e   : > { %v831_v9 = vmul.f32 %v1312_v1, %v826_v8  ;;  %v1208_v10 = vpop.f32.mrb[7].mxu1 }
 0x420   : > { %1002 = vrot.lane.b32.xlu1 %v831_v9, %s1466_s28 }
 0x427   : > { %v991_v12 = vpop.f32.mrb[8].mxu1 }
 0x428   : > { %v996_v13 = vmul.f32 %v1314_v11, %v991_v12  ;;  %v1218_v14 = vpop.f32.mrb[9].mxu1 }
 0x42a   : > { %1006 = vrot.lane.b32.xlu1 %v996_v13, %s1467_s29 }
 0x46b   : > { %v999_v17 = vpop.permute.xlu0 %998 }
 0x46c   : > { %v1009_v20 = vsel %vm339_vm2, %v501_v19, %v999_v17 }
 0x492   : > { %v1003_v18 = vpop.permute.xlu1 %1002 }
 0x493   : > { %v1011_v21 = vsel %vm1010_vm3, %v1009_v20, %v1003_v18 }
 0x49c   : > { %v1007_v22 = vpop.permute.xlu1 %1006 }
 0x49d   : > { %v1013_v23 = vsel %vm1012_vm4, %v1011_v21, %v1007_v22 }
 0x49e   : > { %1014 = vst.msk [vmem:[%s238_s14] sm:$0xff] %vm254_vm1, %v1013_v23 }
 0x49f   : > { %1388 = shalt.err (!%p1385_p9)
}
 0x4a0   : > { %s1389_s25 = scalar_lea.hbm %s1717_s7, 128  ;;  %s1393_s23 = scalar_lea.hbm %s1766_s4, 256 }
 0x4a1   : > { %p1390_p2 = scmp.ne.s32.totalorder %s1717_s7, %s1389_s25  ;;  %p1394_p11 = scmp.lt.u32.totalorder %s1717_s7, %s1766_s4 }
 0x4a2   : > { %p1395_p1 = scmp.lt.u32.totalorder %s1393_s23, %s1389_s25  ;;  %p1397_p6 = scmp.lt.u32.totalorder %s1389_s25, %s1717_s7 }
 0x4a3   : > { %p1391_p5 = pnand %p1390_p2, %p1585_p12 }
 0x4a4   : > { %p1396_p4 = por %p1395_p1, %p1394_p11 }
 0x4a5   : > { %p1392_p0 = pneg %p1391_p5 }
 0x4a6   : > { %p1398_p8 = por %p1397_p6, %p1396_p4 }
 0x4a8   : > { %p1399_p10 = pnand %p1398_p8, %p1392_p0 }
 0x4aa   : > { %1402 = shalt.err (!%p1399_p10)
}
 0x4ab   : > { %1231 = dma.vmem_to_hbm [thread:$0]  (%p1585_p12), %s1719_s20, 128, %s1717_s7, %s1016_s19  }
 0x4ac PF: > { %s1041_s29 = sand.u32 1, %s1433_s15   ;;  %p1781_p13 = scmp.ne.s32.totalorder %s1771_s22, 0 }
 0x4ad   : > { %p1782_p3 = scmp.ge.s32.totalorder %s1445_s18, 2  ;;  %s1042_s10 = scalar_lea.sflag [#allocation4], %s1041_s29 }
 0x4af   : > { %p1242_p7 = pnand %p1782_p3, %p1781_p13 }
 0x4b1   : > { %1428 = dma.done.wait (!%p1242_p7), %s1042_s10, 128  }
 0x4b2   : > { %1430 = vsyncadd (!%p1242_p7), %s1042_s10, 4294967168  ;;  %p18_p9 = scmp.ge.s32.totalorder %s1550_s27, 4   ;;  %s1783_s15 = smov %s1437_s16 }
 0x4b3   : > { %s1784_s16 = smov %s1441_s17  ;;  %s1785_s17 = smov %s1581_s24 }
 0x4b4   : > { %s1786_s18 = smov %s1550_s27  ;;  %20 = sbr.rel (!%p18_p9) target bundleno = 6 (0x6), region = 88 }
 0x4bb   :  { %1047 = vsyncpa [#allocation3], 1 }
 0x4bc   :  { %1049 = vsyncpa [#allocation3 + $0x1], 1 }
 0x4bd   :  { %1050 = vsyncpa [#allocation6], 1 }
 0x4be   :  { %1051 = vsyncpa [#allocation4], 1 }
 0x4bf   :  { %1053 = vsyncpa [#allocation4 + $0x1], 1 }

</bundles_post_ra>
